<compile_context>
chip_gen: v6e
topology: v6e:2x2x1
jax: 0.10.0
libtpu: 0.0.40
codegen_flags: <defaults>
</compile_context>

<pallas_src>
import jax
import jax.numpy as jnp
from jax import lax
from jax.experimental import pallas as pl
from jax.experimental.pallas import tpu as pltpu


def _value_head_kernel(x_ref, w_ref, b_ref, o_ref):
    # x_ref: (tm, D)   token tile, native dtype
    # w_ref: (1, D)    f32 weight row (grid-invariant)
    # b_ref: (1,)      f32 bias scalar in SMEM
    # o_ref: (R, 128)  lane-dense output tile, R = tm // 128
    R = o_ref.shape[0]
    D = x_ref.shape[-1]

    # Hoisted once per grid step (JAX does not CSE broadcast_in_dim in loops).
    w_b = jnp.broadcast_to(w_ref[...].astype(jnp.float32), (128, D))
    b = b_ref[0]

    def body(r, carry):
        row0 = pl.multiple_of(r * 128, 128)
        xn = x_ref[pl.ds(row0, 128), :]                    # (128, D) native dtype
        # leaky_relu(x) @ w == where(x >= 0, x*w, 0.01*(x*w)): sign test on the
        # native values, arithmetic in f32.
        p = xn.astype(jnp.float32) * w_b
        p = jnp.where(xn >= 0, p, jnp.float32(0.01) * p)
        y = jnp.sum(p, axis=-1) + b                        # (128,) f32 lane reduce
        o_ref[pl.ds(r, 1), :] = y.reshape(1, 128).astype(o_ref.dtype)
        return carry

    lax.fori_loop(0, R, body, 0)


def value_head_forward(x, w_out, b_out, *, tm=None):
    """ValueHead forward: out_linear(leaky_relu(x)).

    x: [B, S, D]; w_out: [1, D] (PyTorch Linear weight); b_out: [1].
    Returns [B, S, 1].
    """
    B, S, D = x.shape
    T = B * S
    itemsize = jnp.dtype(x.dtype).itemsize

    t_rounded = pl.cdiv(T, 128) * 128
    if tm is None:
        # ~8 MiB of native-dtype input per grid step (Pallas double-buffers it).
        input_budget = 8 * 1024 * 1024
        tm_sel = max(128, (input_budget // (D * itemsize)) // 128 * 128)
        tm_sel = min(tm_sel, t_rounded)
        # Keep >= ~8 grid steps when the input is big enough so v7x's two
        # TensorCores each get several pipelined steps.
        occ_cap = (t_rounded // (8 * 128)) * 128
        if occ_cap >= 128:
            tm_sel = min(tm_sel, occ_cap)
        tm = max(128, tm_sel)
    else:
        tm = max(128, min((int(tm) // 128) * 128, t_rounded))

    grid = pl.cdiv(T, tm)          # ragged last block handled by Pallas (no pad)
    T_pad = grid * tm
    R = tm // 128

    x2 = x.reshape(T, D)
    w_row = w_out.astype(jnp.float32).reshape(1, D)
    b_s = b_out.astype(jnp.float32).reshape(1)

    # VMEM budget from actual buffers (with 2x margin); cap at 48 MiB so v7x
    # (64 MiB physical) keeps headroom.  v5e/v6e (128 MiB) are unaffected.
    vmem_need = (2 * tm * D * itemsize          # double-buffered input tile
                 + 3 * 128 * D * 4              # live f32 chunk temporaries
                 + 2 * R * 128 * itemsize       # double-buffered output slab
                 + 2 * D * 4 + (1 << 20))       # weight row + slack
    vmem_limit = int(min(max(2 * vmem_need, 32 * 1024 * 1024), 48 * 1024 * 1024))

    out_slab = pl.pallas_call(
        _value_head_kernel,
        out_shape=jax.ShapeDtypeStruct((grid, R, 128), x.dtype),
        grid_spec=pltpu.PrefetchScalarGridSpec(
            num_scalar_prefetch=0,
            grid=(grid,),
            in_specs=[
                pl.BlockSpec((tm, D), lambda i: (i, 0)),
                pl.BlockSpec((1, D), lambda i: (0, 0)),
                pl.BlockSpec(memory_space=pltpu.MemorySpace.SMEM),
            ],
            out_specs=pl.BlockSpec((None, R, 128), lambda i: (i, 0, 0)),
        ),
        compiler_params=pltpu.CompilerParams(
            dimension_semantics=("parallel",),
            vmem_limit_bytes=vmem_limit,
        ),
    )(x2, w_row, b_s)

    # Row-major slab -> flat token order -> [B, S, 1] (padded tail sliced off).
    return out_slab.reshape(T_pad)[:T].reshape(B, S, 1)


def value_head_ref(x, w_out, b_out):
    xf = x.astype(jnp.float32)
    xf = jnp.where(xf >= 0, xf, 0.01 * xf)
    y = jnp.sum(xf * w_out.astype(jnp.float32), axis=-1, keepdims=True)
    return (y + b_out.astype(jnp.float32)).astype(x.dtype)


if __name__ == "__main__":
    key = jax.random.PRNGKey(0)

    # --- Test 1: small shapes per the module spec (batch=2, seq=8, d_model=32).
    B, S, D = 2, 8, 32
    k_x, k_pw, k_pb, k_ow, k_ob, k_x2, k_x3 = jax.random.split(key, 7)

    # p_linear params exist in the module but are unused in forward.
    p_w = jax.random.normal(k_pw, (D, D), jnp.float32) * 0.02   # unused in forward
    p_b = jax.random.normal(k_pb, (D,), jnp.float32) * 0.02     # unused in forward
    out_w = jax.random.normal(k_ow, (1, D), jnp.float32) * 0.1  # out_linear.weight
    out_b = jax.random.normal(k_ob, (1,), jnp.float32) * 0.1    # out_linear.bias

    x = jax.random.normal(k_x, (B, S, D), jnp.float32)
    y = jax.block_until_ready(value_head_forward(x, out_w, out_b))
    y_ref = value_head_ref(x, out_w, out_b)
    assert y.shape == (B, S, 1), y.shape
    assert jnp.allclose(y, y_ref, atol=1e-4, rtol=1e-4), "mismatch vs reference (test 1)"

    # --- Test 2: ragged token count (T=600) + multi-chunk fori_loop, f32.
    B2, S2, D2 = 2, 300, 256
    k_ow2, k_ob2 = jax.random.split(k_pw, 2)
    out_w2 = jax.random.normal(k_ow2, (1, D2), jnp.float32) * 0.05
    out_b2 = jax.random.normal(k_ob2, (1,), jnp.float32) * 0.05
    x_big = jax.random.normal(k_x2, (B2, S2, D2), jnp.float32)
    y2 = jax.block_until_ready(value_head_forward(x_big, out_w2, out_b2))
    y2_ref = value_head_ref(x_big, out_w2, out_b2)
    assert y2.shape == (B2, S2, 1), y2.shape
    assert jnp.allclose(y2, y2_ref, atol=1e-4, rtol=1e-4), "mismatch vs reference (test 2)"

    # --- Test 3: bf16 input, multi-step grid (occupancy cap) + ragged tail.
    B3, S3, D3 = 2, 1224, 512
    k_ow3, k_ob3 = jax.random.split(k_pb, 2)
    out_w3 = jax.random.normal(k_ow3, (1, D3), jnp.float32) * 0.05
    out_b3 = jax.random.normal(k_ob3, (1,), jnp.float32) * 0.05
    x_bf = jax.random.normal(k_x3, (B3, S3, D3), jnp.float32).astype(jnp.bfloat16)
    y3 = jax.block_until_ready(value_head_forward(x_bf, out_w3, out_b3))
    y3_ref = value_head_ref(x_bf, out_w3, out_b3)
    assert y3.shape == (B3, S3, 1), y3.shape
    assert jnp.allclose(y3.astype(jnp.float32), y3_ref.astype(jnp.float32),
                        atol=2e-2, rtol=2e-2), "mismatch vs reference (test 3)"

    print("KERNEL_OK")
</pallas_src>

<mosaic_0001>
module attributes {stable_mosaic.version = 11 : i64} {
  func.func @_value_head_kernel(%arg0: i32, %arg1: memref<128x32xf32, #tpu.memory_space<vmem>>, %arg2: memref<1x32xf32, #tpu.memory_space<vmem>>, %arg3: memref<1xf32, #tpu.memory_space<smem>>, %arg4: memref<1x1x128xf32, #tpu.memory_space<vmem>>) attributes {dimension_semantics = [#tpu.dimension_semantics<parallel>], iteration_bounds = array<i64: 1>, scalar_prefetch = 0 : i64, scratch_operands = 0 : i64, tpu.core_type = #tpu.core_type<tc>, window_params = [{transform_indices = @transform_0, window_bounds = array<i64: 128, 32>}, {pipeline_mode = #tpu.pipeline_mode<synchronous>, transform_indices = @transform_1, window_bounds = array<i64: 1, 32>}, {transform_indices = @transform_2, window_bounds = array<i64: 1>}, {transform_indices = @transform_3, window_bounds = array<i64: 1, 1, 128>}]} {
    %c0 = arith.constant 0 : index
    %c0_0 = arith.constant 0 : index
    %0 = vector.load %arg2[%c0, %c0_0] : memref<1x32xf32, #tpu.memory_space<vmem>>, vector<1x32xf32>
    %1 = vector.shape_cast %0 : vector<1x32xf32> to vector<1x32xf32>
    %2 = vector.broadcast %1 : vector<1x32xf32> to vector<128x32xf32>
    %c0_1 = arith.constant 0 : index
    %3 = memref.load %arg3[%c0_1] : memref<1xf32, #tpu.memory_space<smem>>
    %c0_i32 = arith.constant 0 : i32
    %c128_i32 = arith.constant 128 : i32
    %4 = arith.muli %c0_i32, %c128_i32 : i32
    %5 = tpu.assume_multiple %4, 128 : i32
    %6 = arith.index_cast %5 : i32 to index
    %c0_2 = arith.constant 0 : index
    %7 = vector.load %arg1[%6, %c0_2] : memref<128x32xf32, #tpu.memory_space<vmem>>, vector<128x32xf32>
    %8 = arith.mulf %7, %2 : vector<128x32xf32>
    %cst = arith.constant 0.000000e+00 : f32
    %9 = vector.broadcast %cst : f32 to vector<128x32xf32>
    %10 = arith.cmpf oge, %7, %9 : vector<128x32xf32>
    %cst_3 = arith.constant 0.00999999977 : f32
    %11 = vector.broadcast %cst_3 : f32 to vector<128x32xf32>
    %12 = arith.mulf %11, %8 : vector<128x32xf32>
    %13 = arith.select %10, %8, %12 : vector<128x32xi1>, vector<128x32xf32>
    %cst_4 = arith.constant dense<0.000000e+00> : vector<128xf32>
    %14 = vector.multi_reduction <add>, %13, %cst_4 [1] : vector<128x32xf32> to vector<128xf32>
    %15 = vector.broadcast %3 : f32 to vector<128xf32>
    %16 = arith.addf %14, %15 : vector<128xf32>
    %17 = vector.shape_cast %16 : vector<128xf32> to vector<1x128xf32>
    %c0_5 = arith.constant 0 : index
    %18 = arith.index_cast %c0_i32 : i32 to index
    %c0_6 = arith.constant 0 : index
    %19 = vector.load %arg4[%c0_5, %18, %c0_6] : memref<1x1x128xf32, #tpu.memory_space<vmem>>, vector<1x1x128xf32>
    %20 = vector.shape_cast %19 : vector<1x1x128xf32> to vector<1x128xf32>
    %21 = vector.shape_cast %17 : vector<1x128xf32> to vector<1x1x128xf32>
    tpu.vector_store %arg4[%c0_5, %18, %c0_6], %21 {strides = array<i32>} : memref<1x1x128xf32, #tpu.memory_space<vmem>>, vector<1x1x128xf32>,
    %c1_i32 = arith.constant 1 : i32
    return
  }
  func.func @transform_0(%arg0: i32) -> (i32, i32) {
    %c0_i32 = arith.constant 0 : i32
    %c0_i32_0 = arith.constant 0 : i32
    return %arg0, %c0_i32 : i32, i32
  }
  func.func @transform_1(%arg0: i32) -> (i32, i32) {
    %c0_i32 = arith.constant 0 : i32
    %c0_i32_0 = arith.constant 0 : i32
    %c0_i32_1 = arith.constant 0 : i32
    return %c0_i32, %c0_i32_0 : i32, i32
  }
  func.func @transform_2(%arg0: i32) -> i32 {
    %c0_i32 = arith.constant 0 : i32
    %c0_i32_0 = arith.constant 0 : i32
    return %c0_i32 : i32
  }
  func.func @transform_3(%arg0: i32) -> (i32, i32, i32) {
    %c0_i32 = arith.constant 0 : i32
    %c0_i32_0 = arith.constant 0 : i32
    %c0_i32_1 = arith.constant 0 : i32
    return %arg0, %c0_i32, %c0_i32_0 : i32, i32, i32
  }
}

</mosaic_0001>

<bundles_post_ra>
// kernel: tpu_custom_call.1
= control target key start
LH: loop header
LB: loop body
LE: loop exit
PB: predicated region body
PF: predicated region fallthrough
CT: control target
= control target key end

     0   :  { %9 = vsyncpa [#allocation4], 0  ;;  %s507_s0 = inlined_call_operand.hbm [shape: f32[16,32], index: 0, kind: input, shape index: {}]   ;;  %s508_s1 = inlined_call_operand.vmem [shape: f32[1,32], index: 1, kind: input, shape index: {}]   ;;  %s509_s2 = inlined_call_operand.<no memory space> [shape: f32[1], index: 2, kind: input, shape index: {}]   ;;  %s510_s3 = inlined_call_operand.hbm [shape: f32[1,1,128], index: 3, kind: output, shape index: {}]  }
   0x1   :  { %10 = vsyncpa [#allocation5], 0 }
   0x2   :  { %15 = vsyncadd [#allocation4], 1792  ;;  %s377_s12 = smov [#allocation3]  }
   0x3   :  { %s16_s13 = sshll.u32 %s377_s12, 4  ;;  %s17_s13 = int_to_ptr.vmem [resolvable:$true] %s16_s13 }
   0x4   :  { %s341_s14 = scalar_lea.vmem %s17_s13, 256  ;;  %s345_s15 = scalar_lea.vmem %s17_s13, 2048 }
   0x5   :  { %p342_p0 = scmp.ne.s32.totalorder %s17_s13, %s341_s14  ;;  %p346_p1 = scmp.lt.s32.totalorder %s17_s13, %s17_s13 }
   0x6   :  { %p347_p2 = scmp.lt.s32.totalorder %s345_s15, %s341_s14 }
   0x8   :  { %p348_p3 = por %p347_p2, %p346_p1 }
   0xa   :  { %p349_p4 = pnand %p348_p3, %p342_p0 }
   0xc   :  { %352 = shalt.err (!%p349_p4)
}
   0xd   :  { %s378_s16 = smov 128   ;;  %s379_s17 = smov 8  }
   0xe   :  { %22 = dma.hbm_to_vmem [thread:$0]  %s507_s0, 256, %s17_s13, [#allocation4], %s378_s16, %s378_s16, %s379_s17  }
   0xf   :  { %373 = dma.done.wait [#allocation4], 2048  }
  0x10   :  { %374 = vsyncadd [#allocation4], 4294965248  ;;  %v407_v0 = vld [vmem:[%s508_s1] ss:$0 sm:$0xff]  ;;  %vm118_vm0 = vcmask 261120   ;;  %v40_v2 = vld [vmem:[#allocation3 + $0x10] sm:$0xff] }
  0x11   :  { %v38_v1 = vld [vmem:[#allocation3] sm:$0xff]  ;;  %v56_v4 = vmul.f32 %v407_v0, %v40_v2  ;;  %vm72_vm2 = vcmp.ge.f32.partialorder %v40_v2, 0.0  ;;  %v39_v5 = vld [vmem:[#allocation3 + $0x8] sm:$0xff]  ;;  %v41_v6 = vld [vmem:[#allocation3 + $0x18] sm:$0xff] }
  0x12   :  { %v54_v3 = vmul.f32 %v407_v0, %v38_v1  ;;  %vm70_vm1 = vcmp.ge.f32.partialorder %v38_v1, 0.0  ;;  %v42_v7 = vld [vmem:[#allocation3 + $0x20] sm:$0xff]  ;;  %v55_v8 = vmul.f32 %v407_v0, %v39_v5  ;;  %vm71_vm3 = vcmp.ge.f32.partialorder %v39_v5, 0.0  ;;  %v43_v10 = vld [vmem:[#allocation3 + $0x28] sm:$0xff]  ;;  %v44_v11 = vld [vmem:[#allocation3 + $0x30] sm:$0xff] }
  0x13   :  { %v57_v9 = vmul.f32 %v407_v0, %v41_v6  ;;  %vm73_vm4 = vcmp.ge.f32.partialorder %v41_v6, 0.0  ;;  %v88_v13 = vmul.f32 0.01, %v56_v4  ;;  %v58_v14 = vmul.f32 %v407_v0, %v42_v7  ;;  %v45_v22 = vld [vmem:[#allocation3 + $0x38] sm:$0xff]  ;;  %v46_v27 = vld [vmem:[#allocation3 + $0x40] sm:$0xff]  ;;  %v47_v30 = vld [vmem:[#allocation3 + $0x48] sm:$0xff] }
  0x14   :  { %v86_v12 = vmul.f32 0.01, %v54_v3  ;;  %vm74_vm5 = vcmp.ge.f32.partialorder %v42_v7, 0.0  ;;  %v87_v15 = vmul.f32 0.01, %v55_v8  ;;  %v59_v17 = vmul.f32 %v407_v0, %v43_v10  ;;  %v48_v37 = vld [vmem:[#allocation3 + $0x50] sm:$0xff] }
  0x15   :  { %v89_v16 = vmul.f32 0.01, %v57_v9  ;;  %vm75_vm6 = vcmp.ge.f32.partialorder %v43_v10, 0.0  ;;  %v104_v19 = vsel %vm72_vm2, %v56_v4, %v88_v13  ;;  %v90_v20 = vmul.f32 0.01, %v58_v14  ;;  %v49_v38 = vld [vmem:[#allocation3 + $0x58] sm:$0xff] }
  0x16   :  { %v102_v18 = vsel %vm70_vm1, %v54_v3, %v86_v12  ;;  %v60_v21 = vmul.f32 %v407_v0, %v44_v11  ;;  %v125_v24 = vsel %vm118_vm0, %v104_v19, 0.0  ;;  %v103_v25 = vsel %vm71_vm3, %v55_v8, %v87_v15  ;;  %v50_v49 = vld [vmem:[#allocation3 + $0x60] sm:$0xff]  ;;  %v51_v50 = vld [vmem:[#allocation3 + $0x68] sm:$0xff]  ;;  %v52_v59 = vld [vmem:[#allocation3 + $0x70] sm:$0xff] }
  0x17   :  { %v119_v23 = vsel %vm118_vm0, %v102_v18, 0.0  ;;  %v105_v26 = vsel %vm73_vm4, %v57_v9, %v89_v16  ;;  %126 = vadd.xlane.f32.xlu1 %v125_v24  ;;  %v122_v28 = vsel %vm118_vm0, %v103_v25, 0.0  ;;  %v91_v29 = vmul.f32 0.01, %v59_v17  ;;  %v53_v60 = vld [vmem:[#allocation3 + $0x78] sm:$0xff] }
  0x18   :  { %120 = vadd.xlane.f32.xlu0 %v119_v23  ;;  %v128_v31 = vsel %vm118_vm0, %v105_v26, 0.0  ;;  %v106_v32 = vsel %vm74_vm5, %v58_v14, %v90_v20  ;;  %v92_v33 = vmul.f32 0.01, %v60_v21  ;;  %v61_v34 = vmul.f32 %v407_v0, %v45_v22 }
  0x19   :  { %v107_v35 = vsel %vm75_vm6, %v59_v17, %v91_v29  ;;  %vm76_vm7 = vcmp.ge.f32.partialorder %v44_v11, 0.0  ;;  %v62_v36 = vmul.f32 %v407_v0, %v46_v27  ;;  %vm77_vm8 = vcmp.ge.f32.partialorder %v45_v22, 0.0 }
  0x1a   :  { %v93_v39 = vmul.f32 0.01, %v61_v34  ;;  %v63_v40 = vmul.f32 %v407_v0, %v47_v30  ;;  %v131_v41 = vsel %vm118_vm0, %v106_v32, 0.0  ;;  %v134_v42 = vsel %vm118_vm0, %v107_v35, 0.0 }
  0x1b   :  { %129 = vadd.xlane.f32.xlu1 %v128_v31  ;;  %v108_v43 = vsel %vm76_vm7, %v60_v21, %v92_v33  ;;  %v94_v44 = vmul.f32 0.01, %v62_v36  ;;  %v64_v45 = vmul.f32 %v407_v0, %v48_v37  ;;  %v65_v46 = vmul.f32 %v407_v0, %v49_v38 }
  0x1c   :  { %123 = vadd.xlane.f32.xlu0 %v122_v28  ;;  %v109_v47 = vsel %vm77_vm8, %v61_v34, %v93_v39  ;;  %vm78_vm9 = vcmp.ge.f32.partialorder %v46_v27, 0.0  ;;  %v95_v48 = vmul.f32 0.01, %v63_v40  ;;  %vm79_vm10 = vcmp.ge.f32.partialorder %v47_v30, 0.0 }
  0x1d   :  { %v137_v51 = vsel %vm118_vm0, %v108_v43, 0.0  ;;  %vm80_vm11 = vcmp.ge.f32.partialorder %v48_v37, 0.0  ;;  %v140_v52 = vsel %vm118_vm0, %v109_v47, 0.0  ;;  %v110_v53 = vsel %vm78_vm9, %v62_v36, %v94_v44 }
  0x1e   :  { %v96_v54 = vmul.f32 0.01, %v64_v45  ;;  %v97_v55 = vmul.f32 0.01, %v65_v46  ;;  %v111_v56 = vsel %vm79_vm10, %v63_v40, %v95_v48  ;;  %vm81_vm12 = vcmp.ge.f32.partialorder %v49_v38, 0.0 }
  0x1f   :  { %135 = vadd.xlane.f32.xlu1 %v134_v42  ;;  %v66_v57 = vmul.f32 %v407_v0, %v50_v49  ;;  %v67_v58 = vmul.f32 %v407_v0, %v51_v50  ;;  %v143_v61 = vsel %vm118_vm0, %v110_v53, 0.0  ;;  %v146_v62 = vsel %vm118_vm0, %v111_v56, 0.0 }
  0x20   :  { %132 = vadd.xlane.f32.xlu0 %v131_v41  ;;  %v112_v63 = vsel %vm80_vm11, %v64_v45, %v96_v54  ;;  %v113_v1 = vsel %vm81_vm12, %v65_v46, %v97_v55  ;;  %v68_v4 = vmul.f32 %v407_v0, %v52_v59  ;;  %v69_v5 = vmul.f32 %v407_v0, %v53_v60 }
  0x21   :  { %v98_v2 = vmul.f32 0.01, %v66_v57  ;;  %v99_v3 = vmul.f32 0.01, %v67_v58  ;;  %vm82_vm13 = vcmp.ge.f32.partialorder %v50_v49, 0.0  ;;  %vm83_vm14 = vcmp.ge.f32.partialorder %v51_v50, 0.0 }
  0x22   :  { %v149_v6 = vsel %vm118_vm0, %v112_v63, 0.0  ;;  %v152_v7 = vsel %vm118_vm0, %v113_v1, 0.0  ;;  %v100_v10 = vmul.f32 0.01, %v68_v4  ;;  %v101_v11 = vmul.f32 0.01, %v69_v5 }
  0x23   :  { %141 = vadd.xlane.f32.xlu1 %v140_v52  ;;  %v114_v8 = vsel %vm82_vm13, %v66_v57, %v98_v2  ;;  %v115_v9 = vsel %vm83_vm14, %v67_v58, %v99_v3  ;;  %vm84_vm15 = vcmp.ge.f32.partialorder %v52_v59, 0.0  ;;  %vm85_vm1 = vcmp.ge.f32.partialorder %v53_v60, 0.0 }
  0x24   :  { %138 = vadd.xlane.f32.xlu0 %v137_v51  ;;  %v155_v12 = vsel %vm118_vm0, %v114_v8, 0.0  ;;  %v158_v0 = vsel %vm118_vm0, %v115_v9, 0.0  ;;  %v116_v13 = vsel %vm84_vm15, %v68_v4, %v100_v10  ;;  %v117_v14 = vsel %vm85_vm1, %v69_v5, %v101_v11 }
  0x25   :  { %v161_v15 = vsel %vm118_vm0, %v116_v13, 0.0  ;;  %v164_v16 = vsel %vm118_vm0, %v117_v14, 0.0  ;;  %v200_v17 = vlaneseq  ;;  %v456_v22 = vstv %s509_s2  ;;  %s380_s2 = smov [#allocation6]  }
  0x26   :  { %vm211_vm0 = vcmask 130112   ;;  %vm218_vm2 = vcmask 195712   ;;  %vm225_vm3 = vcmask 261312   ;;  %vm232_vm4 = vcmask 326912   ;;  %s319_s22 = sshll.u32 %s380_s2, 4  ;;  %s320_s22 = int_to_ptr.vmem [resolvable:$true] %s319_s22 }
  0x27   :  { %147 = vadd.xlane.f32.xlu1 %v146_v62  ;;  %v447_v18 = vand.u32 127, %v200_v17  ;;  %v449_v19 = vshrl.u32 %v200_v17, 7  ;;  %vm239_vm5 = vcmask 392512   ;;  %vm246_vm6 = vcmask 458112   ;;  %s353_s23 = scalar_lea.vmem %s320_s22, 16  ;;  %s357_s24 = scalar_lea.vmem %s320_s22, 32 }
  0x28   :  { %144 = vadd.xlane.f32.xlu0 %v143_v61  ;;  %vm253_vm7 = vcmask 523712   ;;  %vm260_vm8 = vcmask 589312   ;;  %vm267_vm9 = vcmask 654912   ;;  %vm274_vm10 = vcmask 720512   ;;  %p354_p5 = scmp.ne.s32.totalorder %s320_s22, %s353_s23  ;;  %p358_p6 = scmp.lt.s32.totalorder %s320_s22, %s320_s22 }
  0x29   :  { %v206_v20 = vadd.s32 4294967288, %v447_v18  ;;  %v220_v21 = vadd.s32 4294967272, %v447_v18  ;;  %v213_v24 = vadd.s32 4294967280, %v447_v18  ;;  %v227_v26 = vadd.s32 4294967264, %v447_v18  ;;  %p359_p7 = scmp.lt.s32.totalorder %s357_s24, %s353_s23 }
  0x2a   :  { %v204_v27 = vsub.s32 %v447_v18, %v449_v19  ;;  %v234_v35 = vadd.s32 4294967256, %v447_v18  ;;  %v241_v42 = vadd.s32 4294967248, %v447_v18  ;;  %v248_v47 = vadd.s32 4294967240, %v447_v18 }
  0x2b   :  { %153 = vadd.xlane.f32.xlu1 %v152_v7  ;;  %v209_v29 = vsub.s32 %v206_v20, %v449_v19  ;;  %v223_v30 = vsub.s32 %v220_v21, %v449_v19  ;;  %v216_v31 = vsub.s32 %v213_v24, %v449_v19  ;;  %v230_v38 = vsub.s32 %v227_v26, %v449_v19  ;;  %p360_p8 = por %p359_p7, %p358_p6 }
  0x2c   :  { %150 = vadd.xlane.f32.xlu0 %v149_v6  ;;  %v237_v45 = vsub.s32 %v234_v35, %v449_v19  ;;  %v244_v54 = vsub.s32 %v241_v42, %v449_v19  ;;  %v255_v55 = vadd.s32 4294967232, %v447_v18  ;;  %v251_v58 = vsub.s32 %v248_v47, %v449_v19 }
  0x2d   :  { %v262_v60 = vadd.s32 4294967224, %v447_v18  ;;  %v269_v3 = vadd.s32 4294967216, %v447_v18  ;;  %v276_v9 = vadd.s32 4294967208, %v447_v18  ;;  %v283_v14 = vadd.s32 4294967200, %v447_v18  ;;  %p361_p9 = pnand %p360_p8, %p354_p5 }
  0x2e   :  { %v258_v2 = vsub.s32 %v255_v55, %v449_v19  ;;  %vm281_vm11 = vcmask 786112   ;;  %vm288_vm12 = vcmask 851712   ;;  %vm295_vm13 = vcmask 917312  }
  0x2f   :  { %159 = vadd.xlane.f32.xlu1 %v158_v0  ;;  %v265_v7 = vsub.s32 %v262_v60, %v449_v19  ;;  %v272_v13 = vsub.s32 %v269_v3, %v449_v19  ;;  %v279_v20 = vsub.s32 %v276_v9, %v449_v19  ;;  %vm302_vm14 = vcmask 982912  }
  0x30   :  { %156 = vadd.xlane.f32.xlu0 %v155_v12  ;;  %vm309_vm15 = vcmask 1048512  }
  0x33   :  { %165 = vadd.xlane.f32.xlu1 %v164_v16 }
  0x34   :  { %162 = vadd.xlane.f32.xlu0 %v161_v15 }
  0xa0   :  { %v127_v25 = vpop.xlane.xlu1 %126 }
  0xa1   :  { %v121_v23 = vpop.xlane.xlu0 %120  ;;  %v170_v32 = vadd.f32 %v456_v22, %v127_v25 }
  0xa2   :  { %v168_v28 = vadd.f32 %v456_v22, %v121_v23  ;;  %v290_v23 = vadd.s32 4294967192, %v447_v18 }
  0xa3   :  { %v217_v43 = vrot.slane %v170_v32, %v216_v31 }
  0xa4   :  { %v130_v34 = vpop.xlane.xlu1 %129  ;;  %v205_v39 = vrot.slane %v168_v28, %v204_v27  ;;  %v286_v28 = vsub.s32 %v283_v14, %v449_v19 }
  0xa5   :  { %v124_v33 = vpop.xlane.xlu0 %123  ;;  %v171_v37 = vadd.f32 %v456_v22, %v130_v34  ;;  %v293_v34 = vsub.s32 %v290_v23, %v449_v19 }
  0xa6   :  { %v169_v36 = vadd.f32 %v456_v22, %v124_v33 }
  0xa7   :  { %v224_v41 = vrot.slane %v171_v37, %v223_v30  ;;  %v304_v30 = vadd.s32 4294967176, %v447_v18 }
  0xa8   :  { %v210_v40 = vrot.slane %v169_v36, %v209_v29  ;;  %v136_v46 = vpop.xlane.xlu1 %135  ;;  %v297_v29 = vadd.s32 4294967184, %v447_v18 }
  0xa9   :  { %v133_v44 = vpop.xlane.xlu0 %132  ;;  %v173_v50 = vadd.f32 %v456_v22, %v136_v46 }
  0xaa   :  { %v212_v48 = vsel %vm211_vm0, %v210_v40, %v205_v39  ;;  %v172_v49 = vadd.f32 %v456_v22, %v133_v44  ;;  %v300_v40 = vsub.s32 %v297_v29, %v449_v19 }
  0xab   :  { %v219_v51 = vsel %vm218_vm2, %v217_v43, %v212_v48  ;;  %v238_v56 = vrot.slane %v173_v50, %v237_v45 }
  0xac   :  { %v226_v52 = vsel %vm225_vm3, %v224_v41, %v219_v51  ;;  %v231_v53 = vrot.slane %v172_v49, %v230_v38  ;;  %v142_v59 = vpop.xlane.xlu1 %141  ;;  %v307_v41 = vsub.s32 %v304_v30, %v449_v19 }
  0xad   :  { %v139_v57 = vpop.xlane.xlu0 %138  ;;  %v175_v63 = vadd.f32 %v456_v22, %v142_v59 }
  0xae   :  { %v233_v61 = vsel %vm232_vm4, %v231_v53, %v226_v52  ;;  %v174_v62 = vadd.f32 %v456_v22, %v139_v57 }
  0xaf   :  { %v240_v4 = vsel %vm239_vm5, %v238_v56, %v233_v61  ;;  %v252_v5 = vrot.slane %v175_v63, %v251_v58 }
  0xb0   :  { %v245_v1 = vrot.slane %v174_v62, %v244_v54  ;;  %v148_v8 = vpop.xlane.xlu1 %147 }
  0xb1   :  { %v145_v6 = vpop.xlane.xlu0 %144  ;;  %v177_v12 = vadd.f32 %v456_v22, %v148_v8 }
  0xb2   :  { %v247_v10 = vsel %vm246_vm6, %v245_v1, %v240_v4  ;;  %v176_v11 = vadd.f32 %v456_v22, %v145_v6 }
  0xb3   :  { %v254_v15 = vsel %vm253_vm7, %v252_v5, %v247_v10  ;;  %v266_v16 = vrot.slane %v177_v12, %v265_v7 }
  0xb4   :  { %v259_v0 = vrot.slane %v176_v11, %v258_v2  ;;  %v154_v21 = vpop.xlane.xlu1 %153 }
  0xb5   :  { %v151_v17 = vpop.xlane.xlu0 %150  ;;  %v179_v26 = vadd.f32 %v456_v22, %v154_v21 }
  0xb6   :  { %v261_v24 = vsel %vm260_vm8, %v259_v0, %v254_v15  ;;  %v178_v25 = vadd.f32 %v456_v22, %v151_v17 }
  0xb7   :  { %v268_v31 = vsel %vm267_vm9, %v266_v16, %v261_v24  ;;  %v280_v32 = vrot.slane %v179_v26, %v279_v20 }
  0xb8   :  { %v273_v27 = vrot.slane %v178_v25, %v272_v13  ;;  %v160_v35 = vpop.xlane.xlu1 %159 }
  0xb9   :  { %v157_v33 = vpop.xlane.xlu0 %156  ;;  %v181_v38 = vadd.f32 %v456_v22, %v160_v35 }
  0xba   :  { %v275_v36 = vsel %vm274_vm10, %v273_v27, %v268_v31  ;;  %v180_v37 = vadd.f32 %v456_v22, %v157_v33 }
  0xbb   :  { %v282_v42 = vsel %vm281_vm11, %v280_v32, %v275_v36  ;;  %v294_v18 = vrot.slane %v181_v38, %v293_v34 }
  0xbc   :  { %v287_v39 = vrot.slane %v180_v37, %v286_v28  ;;  %v166_v44 = vpop.xlane.xlu1 %165 }
  0xbd   :  { %v163_v43 = vpop.xlane.xlu0 %162  ;;  %v183_v47 = vadd.f32 %v456_v22, %v166_v44 }
  0xbe   :  { %v289_v45 = vsel %vm288_vm12, %v287_v39, %v282_v42  ;;  %v182_v46 = vadd.f32 %v456_v22, %v163_v43 }
  0xbf   :  { %v308_v49 = vrot.slane %v183_v47, %v307_v41  ;;  %v296_v50 = vsel %vm295_vm13, %v294_v18, %v289_v45 }
  0xc0   :  { %v301_v48 = vrot.slane %v182_v46, %v300_v40 }
  0xc2   :  { %v303_v51 = vsel %vm302_vm14, %v301_v48, %v296_v50 }
  0xc3   :  { %v310_v19 = vsel %vm309_vm15, %v308_v49, %v303_v51 }
  0xc4   :  { %312 = vst [vmem:[#allocation6] sm:$0x1] %v310_v19 }
  0xc5   :  { %364 = shalt.err (!%p361_p9)
}
  0xc6   :  { %322 = dma.vmem_to_hbm [thread:$0]  %s320_s22, 16, %s510_s3, [#allocation5]  }
  0xc7   :  { %375 = dma.done.wait [#allocation5], 16  }
  0xc8   :  { %376 = vsyncadd [#allocation5], 4294967280 }
  0xc9   :  { %326 = vsyncpa [#allocation4], 1 }
  0xca   :  { %327 = vsyncpa [#allocation5], 1 }

</bundles_post_ra>
